<compile_context>
chip_gen: v7x
topology: tpu7x:2x2x1
jax: 0.10.0
libtpu: 0.0.40
codegen_flags: <defaults>
</compile_context>

<pallas_src>
import functools

import jax
import jax.numpy as jnp
from jax.experimental import pallas as pl
from jax.experimental.pallas import tpu as pltpu

LN_EPS = 1e-5


def _ff_kernel(x_ref, w1_ref, b1_ref, w2_ref, b2_ref, gamma_ref, beta_ref,
               o_ref, acc_ref, h_ref, *, nc, rc, num_f):
    # Grid: (row tiles, F tiles).  x / out blocks are resident across the F
    # axis; w1/w2/b1 blocks stream along it.  acc_ref accumulates linear2
    # output; h_ref holds the pre-activation linear1 blocks for the residual.
    j = pl.program_id(1)

    @pl.when(j == 0)
    def _():
        acc_ref[...] = jnp.zeros_like(acc_ref)

    w1 = w1_ref[...]      # (E, tf)  bf16
    w2 = w2_ref[...]      # (tf, E)  bf16
    b1 = b1_ref[...]      # (1, tf)  f32

    # Row sub-chunks (static, unrolled): lets the scheduler overlap chunk c's
    # VPU work with chunk c+1's MXU matmuls.
    for c in range(nc):
        rows = pl.ds(c * rc, rc)
        xc = x_ref[rows, :].astype(jnp.bfloat16)
        # linear1 block: bf16 MXU inputs, f32 accumulation.
        h = jnp.dot(xc, w1, preferred_element_type=jnp.float32) + b1     # (rc, tf)
        h_ref[j, rows, :] = h          # keep pre-activation block for residual
        # relu -> dropout (identity, eval) -> linear2 block (accumulate over F).
        r = jnp.maximum(h, 0.0).astype(jnp.bfloat16)
        acc_ref[rows, :] += jnp.dot(r, w2, preferred_element_type=jnp.float32)

    @pl.when(j == pl.num_programs(1) - 1)
    def _():
        b2 = b2_ref[...]
        g = gamma_ref[...]
        bt = beta_ref[...]
        for c in range(nc):
            rows = pl.ds(c * rc, rc)
            y = acc_ref[rows, :] + b2                       # linear2 output (rc, E)
            if num_f == 1:
                h_full = h_ref[0, rows, :]
            else:
                # Reassemble full-width pre-activation h (F == E) from blocks;
                # static column layout -> static slices only.
                h_full = jnp.concatenate(
                    [h_ref[f, rows, :] for f in range(num_f)], axis=-1)
            z = h_full + y                                  # residual (pre-activation h)
            # LayerNorm over last dim, two-pass variance (no cancellation).
            mean = jnp.mean(z, axis=-1, keepdims=True)
            zc = z - mean
            var = jnp.mean(zc * zc, axis=-1, keepdims=True)
            zn = zc * jax.lax.rsqrt(var + LN_EPS)
            o_ref[rows, :] = (zn * g + bt).astype(o_ref.dtype)


def _round_up(n, m):
    return ((n + m - 1) // m) * m


def _vmem_limit_bytes():
    kind = ""
    try:
        kind = jax.devices()[0].device_kind.lower()
    except Exception:
        pass
    if "v7" in kind:
        return 48 * 1024 * 1024          # v7x: 64 MiB physical, leave headroom
    if "v4" in kind or "v5" in kind or "v6" in kind:
        return 100 * 1024 * 1024         # 128 MiB physical: use most of it
    return None                          # unknown chip: keep compiler default


def _pick_tf(F):
    # F-tile: full F when small, otherwise a 128-multiple divisor (streams
    # w1 column blocks / w2 row blocks so weights are never fully resident).
    if F <= 1024:
        return F
    for cand in (1024, 512, 256, 128):
        if F % cand == 0:
            return cand
    return F


def _pick_tm(M, E, F, tf, x_bytes, out_bytes, vmem_limit):
    budget = int(0.7 * (vmem_limit if vmem_limit else 48 * 1024 * 1024))
    tm = 512
    while tm > 16:
        need = (2 * tm * E * x_bytes        # x tile (double-buffered)
                + 2 * tm * E * out_bytes    # out tile (double-buffered)
                + 2 * E * tf * 2            # w1 block (double-buffered, bf16)
                + 2 * tf * E * 2            # w2 block (double-buffered, bf16)
                + tm * E * 4                # linear2 accumulator (f32)
                + tm * F * 4)               # pre-activation h blocks (f32)
        if need <= budget:
            break
        tm //= 2
    tm = max(tm, 16)
    tm = min(tm, _round_up(M, 16))          # never bigger than the row count
    # Make sure both v7x TensorCores get a row block when M is large enough.
    if M >= 128 and pl.cdiv(M, tm) < 2:
        tm = max(16, _round_up(pl.cdiv(M, 2), 16))
    return tm


def feed_forward(x, w1, b1, w2, b2, gamma, beta):
    """x: [B, S, E] (f32 or bf16).  w1: [E, F], w2: [F, E] ((in, out) layout;
    pass bf16 to avoid a per-call cast).  b1: [1, F], b2/gamma/beta: [1, E].
    E should be a multiple of 128 for lane-dense output stores."""
    B, S, E = x.shape
    F = w1.shape[1]
    assert F == E, "residual add in this module requires d_ff == embed_dim"
    M = B * S

    # Hoisted cast: weights should already be bf16 (one-time cast at load time).
    w1b = w1 if w1.dtype == jnp.bfloat16 else w1.astype(jnp.bfloat16)
    w2b = w2 if w2.dtype == jnp.bfloat16 else w2.astype(jnp.bfloat16)
    b1f = b1.astype(jnp.float32)
    b2f = b2.astype(jnp.float32)
    gf = gamma.astype(jnp.float32)
    bf = beta.astype(jnp.float32)

    out_dtype = x.dtype
    vmem_limit = _vmem_limit_bytes()
    tf = _pick_tf(F)
    num_f = F // tf
    x_bytes = jnp.dtype(x.dtype).itemsize
    out_bytes = jnp.dtype(out_dtype).itemsize
    tm = _pick_tm(M, E, F, tf, x_bytes, out_bytes, vmem_limit)

    # Row sub-chunking factor (rc stays a multiple of 16 for bf16 packing).
    nc = 1
    for cand in (4, 2, 1):
        if tm % (cand * 16) == 0:
            nc = cand
            break
    rc = tm // nc

    x2 = x.reshape(M, E)            # no pad: Pallas masks the ragged last block
    grid = (pl.cdiv(M, tm), num_f)

    kernel = functools.partial(_ff_kernel, nc=nc, rc=rc, num_f=num_f)

    cp_kwargs = dict(dimension_semantics=("parallel", "arbitrary"))
    if vmem_limit is not None:
        cp_kwargs["vmem_limit_bytes"] = vmem_limit

    out2 = pl.pallas_call(
        kernel,
        out_shape=jax.ShapeDtypeStruct((M, E), out_dtype),
        grid_spec=pltpu.PrefetchScalarGridSpec(
            num_scalar_prefetch=0,
            grid=grid,
            in_specs=[
                pl.BlockSpec((tm, E), lambda i, j: (i, 0)),    # x rows (resident over j)
                pl.BlockSpec((E, tf), lambda i, j: (0, j)),    # w1 column block (streamed)
                pl.BlockSpec((1, tf), lambda i, j: (0, j)),    # b1 block
                pl.BlockSpec((tf, E), lambda i, j: (j, 0)),    # w2 row block (streamed)
                pl.BlockSpec((1, E), lambda i, j: (0, 0)),     # b2
                pl.BlockSpec((1, E), lambda i, j: (0, 0)),     # gamma
                pl.BlockSpec((1, E), lambda i, j: (0, 0)),     # beta
            ],
            out_specs=pl.BlockSpec((tm, E), lambda i, j: (i, 0)),
            scratch_shapes=[
                pltpu.VMEM((tm, E), jnp.float32),              # linear2 accumulator
                pltpu.VMEM((num_f, tm, tf), jnp.float32),      # pre-activation h blocks
            ],
        ),
        compiler_params=pltpu.CompilerParams(**cp_kwargs),
    )(x2, w1b, b1f, w2b, b2f, gf, bf)

    return out2.reshape(B, S, E)


def _reference(x, w1, b1, w2, b2, gamma, beta):
    # Pure-JAX f32 reference mirroring the PyTorch forward (eval-mode dropout).
    h = x @ w1 + b1[0]
    y = jnp.maximum(h, 0.0) @ w2 + b2[0]
    z = h + y
    mean = jnp.mean(z, axis=-1, keepdims=True)
    var = jnp.mean((z - mean) ** 2, axis=-1, keepdims=True)
    zn = (z - mean) / jnp.sqrt(var + LN_EPS)
    return zn * gamma[0] + beta[0]


if __name__ == "__main__":
    B, S = 2, 8
    embed_dim = 128   # multiple of 128 -> lane-dense output stores
    d_ff = 128        # must equal embed_dim for the module's residual add

    key = jax.random.PRNGKey(0)
    kx, k1, kb1, k2, kb2, kg, kbt = jax.random.split(key, 7)

    x = jax.random.normal(kx, (B, S, embed_dim), dtype=jnp.float32)

    # Deterministic parameter init (matching nn.Linear uniform bounds).
    lim1 = 1.0 / (embed_dim ** 0.5)
    lim2 = 1.0 / (d_ff ** 0.5)
    w1 = jax.random.uniform(k1, (embed_dim, d_ff), jnp.float32, -lim1, lim1)
    b1 = jax.random.uniform(kb1, (1, d_ff), jnp.float32, -lim1, lim1)
    w2 = jax.random.uniform(k2, (d_ff, embed_dim), jnp.float32, -lim2, lim2)
    b2 = jax.random.uniform(kb2, (1, embed_dim), jnp.float32, -lim2, lim2)
    # LayerNorm affine params (default is ones/zeros; perturb to exercise affine).
    gamma = jnp.ones((1, embed_dim), jnp.float32) + 0.1 * jax.random.normal(kg, (1, embed_dim))
    beta = 0.1 * jax.random.normal(kbt, (1, embed_dim), dtype=jnp.float32)

    # Hoist the one-time weight cast out of the hot path (as a real model would).
    w1b = w1.astype(jnp.bfloat16)
    w2b = w2.astype(jnp.bfloat16)

    out = feed_forward(x, w1b, b1, w2b, b2, gamma, beta)
    out = jax.block_until_ready(out)

    ref = _reference(x, w1, b1, w2, b2, gamma, beta)
    assert out.shape == (B, S, embed_dim)
    # Loosened tolerance: matmul inputs are bf16 (f32 accumulation), ref is f32.
    assert jnp.allclose(out, ref, atol=5e-2, rtol=5e-2), "mismatch vs reference"

    print("KERNEL_OK")
</pallas_src>

<mosaic_0001>
module attributes {stable_mosaic.version = 11 : i64} {
  func.func @_ff_kernel(%arg0: i32, %arg1: i32, %arg2: memref<16x128xf32, #tpu.memory_space<vmem>>, %arg3: memref<128x128xbf16, #tpu.memory_space<vmem>>, %arg4: memref<1x128xf32, #tpu.memory_space<vmem>>, %arg5: memref<128x128xbf16, #tpu.memory_space<vmem>>, %arg6: memref<1x128xf32, #tpu.memory_space<vmem>>, %arg7: memref<1x128xf32, #tpu.memory_space<vmem>>, %arg8: memref<1x128xf32, #tpu.memory_space<vmem>>, %arg9: memref<16x128xf32, #tpu.memory_space<vmem>>, %arg10: memref<16x128xf32, #tpu.memory_space<vmem>>, %arg11: memref<1x16x128xf32, #tpu.memory_space<vmem>>) attributes {dimension_semantics = [#tpu.dimension_semantics<parallel>, #tpu.dimension_semantics<arbitrary>], iteration_bounds = array<i64: 1, 1>, scalar_prefetch = 0 : i64, scratch_operands = 2 : i64, tpu.core_type = #tpu.core_type<tc>, window_params = [{transform_indices = @transform_0, window_bounds = array<i64: 16, 128>}, {transform_indices = @transform_1, window_bounds = array<i64: 128, 128>}, {transform_indices = @transform_2, window_bounds = array<i64: 1, 128>}, {transform_indices = @transform_3, window_bounds = array<i64: 128, 128>}, {pipeline_mode = #tpu.pipeline_mode<synchronous>, transform_indices = @transform_4, window_bounds = array<i64: 1, 128>}, {pipeline_mode = #tpu.pipeline_mode<synchronous>, transform_indices = @transform_5, window_bounds = array<i64: 1, 128>}, {pipeline_mode = #tpu.pipeline_mode<synchronous>, transform_indices = @transform_6, window_bounds = array<i64: 1, 128>}, {transform_indices = @transform_7, window_bounds = array<i64: 16, 128>}]} {
    %c0_i32 = arith.constant 0 : i32
    %0 = arith.cmpi eq, %arg1, %c0_i32 : i32
    %1 = arith.extui %0 : i1 to i32
    %c0_i32_0 = arith.constant 0 : i32
    %2 = arith.cmpi ne, %1, %c0_i32_0 : i32
    scf.if %2 {
      %cst_18 = arith.constant 0.000000e+00 : f32
      %25 = vector.broadcast %cst_18 : f32 to vector<16x128xf32>
      %c0_19 = arith.constant 0 : index
      %c0_20 = arith.constant 0 : index
      %26 = vector.load %arg10[%c0_19, %c0_20] : memref<16x128xf32, #tpu.memory_space<vmem>>, vector<16x128xf32>
      tpu.vector_store %arg10[%c0_19, %c0_20], %25 {strides = array<i32>} : memref<16x128xf32, #tpu.memory_space<vmem>>, vector<16x128xf32>,
    } else {
    }
    %c0 = arith.constant 0 : index
    %c0_1 = arith.constant 0 : index
    %3 = vector.load %arg3[%c0, %c0_1] : memref<128x128xbf16, #tpu.memory_space<vmem>>, vector<128x128xbf16>
    %c0_2 = arith.constant 0 : index
    %c0_3 = arith.constant 0 : index
    %4 = vector.load %arg5[%c0_2, %c0_3] : memref<128x128xbf16, #tpu.memory_space<vmem>>, vector<128x128xbf16>
    %c0_4 = arith.constant 0 : index
    %c0_5 = arith.constant 0 : index
    %5 = vector.load %arg4[%c0_4, %c0_5] : memref<1x128xf32, #tpu.memory_space<vmem>>, vector<1x128xf32>
    %c0_6 = arith.constant 0 : index
    %c0_7 = arith.constant 0 : index
    %6 = vector.load %arg2[%c0_6, %c0_7] : memref<16x128xf32, #tpu.memory_space<vmem>>, vector<16x128xf32>
    %7 = arith.truncf %6 : vector<16x128xf32> to vector<16x128xbf16>
    %cst = arith.constant dense<0.000000e+00> : vector<16x128xf32>
    %8 = tpu.matmul %7, %3, %cst {dimension_numbers = #tpu.dot_dimension_numbers<[1], [0], [0], [1], [0, 0, 1, 1], [], []>} : vector<16x128xbf16>, vector<128x128xbf16>, vector<16x128xf32> -> vector<16x128xf32>
    %9 = vector.broadcast %5 : vector<1x128xf32> to vector<16x128xf32>
    %10 = arith.addf %8, %9 : vector<16x128xf32>
    %11 = arith.index_cast %arg1 : i32 to index
    %c0_8 = arith.constant 0 : index
    %c0_9 = arith.constant 0 : index
    %12 = vector.load %arg11[%11, %c0_8, %c0_9] : memref<1x16x128xf32, #tpu.memory_space<vmem>>, vector<1x16x128xf32>
    %13 = vector.shape_cast %12 : vector<1x16x128xf32> to vector<16x128xf32>
    %14 = vector.shape_cast %10 : vector<16x128xf32> to vector<1x16x128xf32>
    tpu.vector_store %arg11[%11, %c0_8, %c0_9], %14 {strides = array<i32>} : memref<1x16x128xf32, #tpu.memory_space<vmem>>, vector<1x16x128xf32>,
    %cst_10 = arith.constant 0.000000e+00 : f32
    %15 = vector.broadcast %cst_10 : f32 to vector<16x128xf32>
    %16 = arith.maximumf %10, %15 : vector<16x128xf32>
    %17 = arith.truncf %16 : vector<16x128xf32> to vector<16x128xbf16>
    %c0_11 = arith.constant 0 : index
    %c0_12 = arith.constant 0 : index
    %18 = vector.load %arg10[%c0_11, %c0_12] : memref<16x128xf32, #tpu.memory_space<vmem>>, vector<16x128xf32>
    %cst_13 = arith.constant dense<0.000000e+00> : vector<16x128xf32>
    %19 = tpu.matmul %17, %4, %cst_13 {dimension_numbers = #tpu.dot_dimension_numbers<[1], [0], [0], [1], [0, 0, 1, 1], [], []>} : vector<16x128xbf16>, vector<128x128xbf16>, vector<16x128xf32> -> vector<16x128xf32>
    %20 = arith.addf %18, %19 : vector<16x128xf32>
    %c0_14 = arith.constant 0 : index
    %c0_15 = arith.constant 0 : index
    %21 = vector.load %arg10[%c0_14, %c0_15] : memref<16x128xf32, #tpu.memory_space<vmem>>, vector<16x128xf32>
    tpu.vector_store %arg10[%c0_14, %c0_15], %20 {strides = array<i32>} : memref<16x128xf32, #tpu.memory_space<vmem>>, vector<16x128xf32>,
    %c0_i32_16 = arith.constant 0 : i32
    %22 = arith.cmpi eq, %arg1, %c0_i32_16 : i32
    %23 = arith.extui %22 : i1 to i32
    %c0_i32_17 = arith.constant 0 : i32
    %24 = arith.cmpi ne, %23, %c0_i32_17 : i32
    scf.if %24 {
      %c0_18 = arith.constant 0 : index
      %c0_19 = arith.constant 0 : index
      %25 = vector.load %arg6[%c0_18, %c0_19] : memref<1x128xf32, #tpu.memory_space<vmem>>, vector<1x128xf32>
      %c0_20 = arith.constant 0 : index
      %c0_21 = arith.constant 0 : index
      %26 = vector.load %arg7[%c0_20, %c0_21] : memref<1x128xf32, #tpu.memory_space<vmem>>, vector<1x128xf32>
      %c0_22 = arith.constant 0 : index
      %c0_23 = arith.constant 0 : index
      %27 = vector.load %arg8[%c0_22, %c0_23] : memref<1x128xf32, #tpu.memory_space<vmem>>, vector<1x128xf32>
      %c0_24 = arith.constant 0 : index
      %c0_25 = arith.constant 0 : index
      %28 = vector.load %arg10[%c0_24, %c0_25] : memref<16x128xf32, #tpu.memory_space<vmem>>, vector<16x128xf32>
      %29 = vector.broadcast %25 : vector<1x128xf32> to vector<16x128xf32>
      %30 = arith.addf %28, %29 : vector<16x128xf32>
      %c0_26 = arith.constant 0 : index
      %c0_27 = arith.constant 0 : index
      %c0_28 = arith.constant 0 : index
      %31 = vector.load %arg11[%c0_26, %c0_27, %c0_28] : memref<1x16x128xf32, #tpu.memory_space<vmem>>, vector<1x16x128xf32>
      %32 = vector.shape_cast %31 : vector<1x16x128xf32> to vector<16x128xf32>
      %33 = arith.addf %32, %30 : vector<16x128xf32>
      %cst_29 = arith.constant dense<0.000000e+00> : vector<16xf32>
      %34 = vector.multi_reduction <add>, %33, %cst_29 [1] : vector<16x128xf32> to vector<16xf32>
      %35 = vector.shape_cast %34 : vector<16xf32> to vector<16x1xf32>
      %cst_30 = arith.constant 1.280000e+02 : f32
      %36 = vector.broadcast %cst_30 : f32 to vector<16x1xf32>
      %37 = arith.divf %35, %36 : vector<16x1xf32>
      %38 = vector.broadcast %37 : vector<16x1xf32> to vector<16x128xf32>
      %39 = arith.subf %33, %38 : vector<16x128xf32>
      %40 = arith.mulf %39, %39 : vector<16x128xf32>
      %cst_31 = arith.constant dense<0.000000e+00> : vector<16xf32>
      %41 = vector.multi_reduction <add>, %40, %cst_31 [1] : vector<16x128xf32> to vector<16xf32>
      %42 = vector.shape_cast %41 : vector<16xf32> to vector<16x1xf32>
      %cst_32 = arith.constant 1.280000e+02 : f32
      %43 = vector.broadcast %cst_32 : f32 to vector<16x1xf32>
      %44 = arith.divf %42, %43 : vector<16x1xf32>
      %cst_33 = arith.constant 9.99999974E-6 : f32
      %45 = vector.broadcast %cst_33 : f32 to vector<16x1xf32>
      %46 = arith.addf %44, %45 : vector<16x1xf32>
      %47 = math.rsqrt %46 : vector<16x1xf32>
      %48 = vector.broadcast %47 : vector<16x1xf32> to vector<16x128xf32>
      %49 = arith.mulf %39, %48 : vector<16x128xf32>
      %50 = vector.broadcast %26 : vector<1x128xf32> to vector<16x128xf32>
      %51 = arith.mulf %49, %50 : vector<16x128xf32>
      %52 = vector.broadcast %27 : vector<1x128xf32> to vector<16x128xf32>
      %53 = arith.addf %51, %52 : vector<16x128xf32>
      %c0_34 = arith.constant 0 : index
      %c0_35 = arith.constant 0 : index
      %54 = vector.load %arg9[%c0_34, %c0_35] : memref<16x128xf32, #tpu.memory_space<vmem>>, vector<16x128xf32>
      tpu.vector_store %arg9[%c0_34, %c0_35], %53 {strides = array<i32>} : memref<16x128xf32, #tpu.memory_space<vmem>>, vector<16x128xf32>,
    } else {
    }
    return
  }
  func.func @transform_0(%arg0: i32, %arg1: i32) -> (i32, i32) {
    %c0_i32 = arith.constant 0 : i32
    %c0_i32_0 = arith.constant 0 : i32
    return %arg0, %c0_i32 : i32, i32
  }
  func.func @transform_1(%arg0: i32, %arg1: i32) -> (i32, i32) {
    %c0_i32 = arith.constant 0 : i32
    %c0_i32_0 = arith.constant 0 : i32
    return %c0_i32, %arg1 : i32, i32
  }
  func.func @transform_2(%arg0: i32, %arg1: i32) -> (i32, i32) {
    %c0_i32 = arith.constant 0 : i32
    %c0_i32_0 = arith.constant 0 : i32
    return %c0_i32, %arg1 : i32, i32
  }
  func.func @transform_3(%arg0: i32, %arg1: i32) -> (i32, i32) {
    %c0_i32 = arith.constant 0 : i32
    %c0_i32_0 = arith.constant 0 : i32
    return %arg1, %c0_i32 : i32, i32
  }
  func.func @transform_4(%arg0: i32, %arg1: i32) -> (i32, i32) {
    %c0_i32 = arith.constant 0 : i32
    %c0_i32_0 = arith.constant 0 : i32
    %c0_i32_1 = arith.constant 0 : i32
    return %c0_i32, %c0_i32_0 : i32, i32
  }
  func.func @transform_5(%arg0: i32, %arg1: i32) -> (i32, i32) {
    %c0_i32 = arith.constant 0 : i32
    %c0_i32_0 = arith.constant 0 : i32
    %c0_i32_1 = arith.constant 0 : i32
    return %c0_i32, %c0_i32_0 : i32, i32
  }
  func.func @transform_6(%arg0: i32, %arg1: i32) -> (i32, i32) {
    %c0_i32 = arith.constant 0 : i32
    %c0_i32_0 = arith.constant 0 : i32
    %c0_i32_1 = arith.constant 0 : i32
    return %c0_i32, %c0_i32_0 : i32, i32
  }
  func.func @transform_7(%arg0: i32, %arg1: i32) -> (i32, i32) {
    %c0_i32 = arith.constant 0 : i32
    %c0_i32_0 = arith.constant 0 : i32
    return %arg0, %c0_i32 : i32, i32
  }
}

</mosaic_0001>

<bundles_post_ra>
// kernel: tpu_custom_call.1
= control target key start
LH: loop header
LB: loop body
LE: loop exit
PB: predicated region body
PF: predicated region fallthrough
CT: control target
= control target key end

     0   :  { %12 = vsyncpa [#allocation5], 0  ;;  %s711_s0 = inlined_call_operand.hbm [shape: f32[16,128], index: 0, kind: input, shape index: {}]   ;;  %s712_s1 = inlined_call_operand.hbm [shape: bf16[128,128], index: 1, kind: input, shape index: {}]   ;;  %s713_s2 = inlined_call_operand.vmem [shape: f32[1,128], index: 2, kind: input, shape index: {}]   ;;  %s714_s3 = inlined_call_operand.hbm [shape: bf16[128,128], index: 3, kind: input, shape index: {}]   ;;  %s715_s4 = inlined_call_operand.vmem [shape: f32[1,128], index: 4, kind: input, shape index: {}]   ;;  %s716_s5 = inlined_call_operand.vmem [shape: f32[1,128], index: 5, kind: input, shape index: {}]   ;;  %s717_s6 = inlined_call_operand.vmem [shape: f32[1,128], index: 6, kind: input, shape index: {}]   ;;  %s718_s7 = inlined_call_operand.hbm [shape: f32[16,128], index: 7, kind: output, shape index: {}]  }
   0x1   :  { %13 = vsyncpa [#allocation8], 0 }
   0x2   :  { %14 = vsyncpa [#allocation6], 0  ;;  %s589_s24 = smov [#allocation7]   ;;  %s495_s28 = scalar_lea.hbm %s712_s1, 1024 }
   0x3   :  { %s32_s25 = sshll.u32 %s589_s24, 4  ;;  %p496_p0 = scmp.ne.s32.totalorder %s712_s1, %s495_s28  ;;  %s33_s25 = int_to_ptr.vmem [resolvable:$true] %s32_s25 }
   0x4   :  { %p499_p1 = scmp.lt.u32.totalorder %s495_s28, %s712_s1 }
   0x6   :  { %p501_p2 = pnand %p499_p1, %p496_p0 }
   0x8   :  { %504 = shalt.err (!%p501_p2)
}
   0x9   :  { %s505_s10 = scalar_lea.vmem %s33_s25, 1024  ;;  %p510_p4 = scmp.lt.s32.totalorder %s33_s25, %s33_s25 }
   0xa   :  { %p506_p3 = scmp.ne.s32.totalorder %s33_s25, %s505_s10  ;;  %p511_p5 = scmp.lt.s32.totalorder %s505_s10, %s505_s10 }
   0xc   :  { %p512_p6 = por %p511_p5, %p510_p4 }
   0xe   :  { %p513_p7 = pnand %p512_p6, %p506_p3 }
  0x10   :  { %516 = shalt.err (!%p513_p7)
}
  0x11   :  { %s590_s11 = smov 64   ;;  %s591_s12 = smov 4  }
  0x12   :  { %38 = dma.hbm_to_vmem [thread:$0]  %s712_s1, 1024, %s33_s25, [#allocation8], %s590_s11, %s590_s11, %s591_s12  }
  0x13   :  { %s592_s15 = smov [#allocation4]   ;;  %s517_s19 = scalar_lea.hbm %s711_s0, 256 }
  0x14   :  { %s20_s16 = sshll.u32 %s592_s15, 4  ;;  %p518_p8 = scmp.ne.s32.totalorder %s711_s0, %s517_s19  ;;  %s21_s16 = int_to_ptr.vmem [resolvable:$true] %s20_s16 }
  0x15   :  { %p521_p9 = scmp.lt.u32.totalorder %s517_s19, %s711_s0 }
  0x17   :  { %p523_p10 = pnand %p521_p9, %p518_p8 }
  0x19   :  { %526 = shalt.err (!%p523_p10)
}
  0x1a   :  { %s527_s24 = scalar_lea.vmem %s21_s16, 256  ;;  %p532_p12 = scmp.lt.s32.totalorder %s21_s16, %s21_s16 }
  0x1b   :  { %p528_p11 = scmp.ne.s32.totalorder %s21_s16, %s527_s24  ;;  %p533_p13 = scmp.lt.s32.totalorder %s527_s24, %s527_s24 }
  0x1d   :  { %p534_p0 = por %p533_p13, %p532_p12 }
  0x1f   :  { %p535_p1 = pnand %p534_p0, %p528_p11 }
  0x21   :  { %538 = shalt.err (!%p535_p1)
}
  0x22   :  { %s593_s1 = smov 128   ;;  %s594_s25 = smov 8  }
  0x23   :  { %26 = dma.hbm_to_vmem [thread:$0]  %s711_s0, 256, %s21_s16, [#allocation5], %s593_s1, %s593_s1, %s594_s25  }
  0x24   :  { %s595_s28 = smov [#allocation9]   ;;  %s539_s9 = scalar_lea.hbm %s714_s3, 1024 }
  0x25   :  { %s46_s29 = sshll.u32 %s595_s28, 4  ;;  %p540_p2 = scmp.ne.s32.totalorder %s714_s3, %s539_s9  ;;  %s47_s29 = int_to_ptr.vmem [resolvable:$true] %s46_s29 }
  0x26   :  { %p543_p3 = scmp.lt.u32.totalorder %s539_s9, %s714_s3 }
  0x28   :  { %p545_p4 = pnand %p543_p3, %p540_p2 }
  0x2a   :  { %548 = shalt.err (!%p545_p4)
}
  0x2b   :  { %s549_s17 = scalar_lea.vmem %s47_s29, 1024  ;;  %p554_p6 = scmp.lt.s32.totalorder %s47_s29, %s47_s29 }
  0x2c   :  { %p550_p5 = scmp.ne.s32.totalorder %s47_s29, %s549_s17  ;;  %p555_p7 = scmp.lt.s32.totalorder %s549_s17, %s549_s17 }
  0x2e   :  { %p556_p8 = por %p555_p7, %p554_p6 }
  0x30   :  { %p557_p9 = pnand %p556_p8, %p550_p5 }
  0x32   :  { %560 = shalt.err (!%p557_p9)
}
  0x33   :  { %52 = dma.hbm_to_vmem [thread:$0]  %s714_s3, 1024, %s47_s29, [#allocation8], %s590_s11, %s590_s11, %s591_s12  }
  0x34   :  { %583 = dma.done.wait [#allocation5], 256  }
  0x35   :  { %584 = vsyncadd [#allocation5], 4294967040 }
  0x36   :  { %585 = dma.done.wait [#allocation8], 2048  }
  0x37   :  { %586 = vsyncadd [#allocation8], 4294965248  ;;  %v596_v0 = vmov 0.0   ;;  %vm597_vm0 = vmmov 0   ;;  %v475_v1 = vld [vmem:[#allocation7] sm:$0xff]   ;;  %v476_v2 = vld [vmem:[#allocation7 + $0x8] sm:$0xff]  }
  0x38   :  { %425 = vmatprep.subr.bf16.mxu0 %v596_v0  ;;  %441 = vmatprep.mubr.msk.bf16.mxu0 %vm597_vm0, %v596_v0  ;;  %v477_v3 = vld [vmem:[#allocation7 + $0x10] sm:$0xff]   ;;  %v483_v4 = vld [vmem:[#allocation9] sm:$0xff]   ;;  %v478_v5 = vld [vmem:[#allocation7 + $0x18] sm:$0xff]   ;;  %s598_s21 = smov [#allocation10]  }
  0x39   :  { %445 = vmatprep.subr.bf16.mxu1 %v596_v0  ;;  %461 = vmatprep.mubr.msk.bf16.mxu1 %vm597_vm0, %v596_v0  ;;  %v484_v6 = vld [vmem:[#allocation9 + $0x8] sm:$0xff]   ;;  %v479_v7 = vld [vmem:[#allocation7 + $0x20] sm:$0xff]   ;;  %v485_v8 = vld [vmem:[#allocation9 + $0x10] sm:$0xff]   ;;  %s374_s22 = sshll.u32 %s598_s21, 4  ;;  %s375_s22 = int_to_ptr.vmem [resolvable:$true] %s374_s22 }
  0x3a   :  { %426 = vmatpush3.bf16.msra.mxu0 %v475_v1  ;;  %446 = vmatpush3.bf16.msra.mxu1 %v483_v4  ;;  %v480_v9 = vld [vmem:[#allocation7 + $0x28] sm:$0xff]   ;;  %v486_v10 = vld [vmem:[#allocation9 + $0x18] sm:$0xff]   ;;  %v481_v11 = vld [vmem:[#allocation7 + $0x30] sm:$0xff]   ;;  %s561_s23 = scalar_lea.vmem %s375_s22, 256  ;;  %p566_p11 = scmp.lt.s32.totalorder %s375_s22, %s375_s22 }
  0x3b   :  { %427 = vmatprep.subr.bf16.mxu0 %v596_v0  ;;  %447 = vmatprep.subr.bf16.mxu1 %v596_v0  ;;  %v487_v12 = vld [vmem:[#allocation9 + $0x20] sm:$0xff]   ;;  %v482_v13 = vld [vmem:[#allocation7 + $0x38] sm:$0xff]   ;;  %v108_v14 = vld [vmem:[#allocation4] sm:$0xff]  ;;  %p562_p10 = scmp.ne.s32.totalorder %s375_s22, %s561_s23  ;;  %p567_p12 = scmp.lt.s32.totalorder %s561_s23, %s561_s23 }
  0x3c   :  { %v109_v15 = vld [vmem:[#allocation4 + $0x8] sm:$0xff]  ;;  %v488_v16 = vld [vmem:[#allocation9 + $0x28] sm:$0xff]   ;;  %v489_v18 = vld [vmem:[#allocation9 + $0x30] sm:$0xff]  }
  0x3d   :  { %v110_v17 = vpack.c.bf16 %v109_v15, %v108_v14  ;;  %v490_v19 = vld [vmem:[#allocation9 + $0x38] sm:$0xff]   ;;  %v387_v20 = vld [vmem:[%s713_s2] ss:$0 sm:$0xff]  ;;  %p568_p13 = por %p567_p12, %p566_p11 }
  0x3e   :  { %428 = vmatpush3.bf16.msra.mxu0 %v476_v2  ;;  %448 = vmatpush3.bf16.msra.mxu1 %v484_v6  ;;  %v404_v30 = vld [vmem:[%s715_s4] ss:$0 sm:$0xff] }
  0x3f   :  { %429 = vmatprep.subr.bf16.mxu0 %v596_v0  ;;  %449 = vmatprep.subr.bf16.mxu1 %v596_v0  ;;  %v405_v54 = vld [vmem:[%s716_s5] ss:$0 sm:$0xff]  ;;  %p569_p0 = pnand %p568_p13, %p562_p10 }
  0x40   :  { %v406_v56 = vld [vmem:[%s717_s6] ss:$0 sm:$0xff] }
  0x42   :  { %430 = vmatpush3.bf16.msra.mxu0 %v477_v3  ;;  %450 = vmatpush3.bf16.msra.mxu1 %v485_v8 }
  0x43   :  { %431 = vmatprep.subr.bf16.mxu0 %v596_v0  ;;  %451 = vmatprep.subr.bf16.mxu1 %v596_v0 }
  0x46   :  { %432 = vmatpush3.bf16.msra.mxu0 %v478_v5  ;;  %452 = vmatpush3.bf16.msra.mxu1 %v486_v10 }
  0x47   :  { %433 = vmatprep.subr.bf16.mxu0 %v596_v0  ;;  %453 = vmatprep.subr.bf16.mxu1 %v596_v0 }
  0x4a   :  { %434 = vmatpush3.bf16.msra.mxu0 %v479_v7  ;;  %454 = vmatpush3.bf16.msra.mxu1 %v487_v12 }
  0x4b   :  { %435 = vmatprep.subr.bf16.mxu0 %v596_v0  ;;  %455 = vmatprep.subr.bf16.mxu1 %v596_v0 }
  0x4e   :  { %436 = vmatpush3.bf16.msra.mxu0 %v480_v9  ;;  %456 = vmatpush3.bf16.msra.mxu1 %v488_v16 }
  0x4f   :  { %437 = vmatprep.subr.bf16.mxu0 %v596_v0  ;;  %457 = vmatprep.subr.bf16.mxu1 %v596_v0 }
  0x52   :  { %438 = vmatpush3.bf16.msra.mxu0 %v481_v11  ;;  %458 = vmatpush3.bf16.msra.mxu1 %v489_v18 }
  0x53   :  { %439 = vmatprep.subr.bf16.mxu0 %v596_v0  ;;  %459 = vmatprep.subr.bf16.mxu1 %v596_v0 }
  0x56   :  { %440 = vmatpush3.bf16.msra.mxu0 %v482_v13  ;;  %460 = vmatpush3.bf16.msra.mxu1 %v490_v19 }
  0x59   :  { %442 = vmatmul.mubr.bf16.vlgmr.msra.gmra.mrb[0].mxu0 %v110_v17 }
 0x12c   :  { %v199_v21 = vpop.f32.mrb[0].mxu0 }
 0x12d   :  { %v200_v22 = vadd.f32 %v387_v20, %v199_v21  ;;  %v443_v23 = vpop.f32.mrb[1].mxu0 }
 0x12e   :  { %v202_v24 = vpop.f32.mrb[2].mxu0 }
 0x12f   :  { %v203_v25 = vadd.f32 %v387_v20, %v202_v24  ;;  %v444_v26 = vpop.f32.mrb[3].mxu0  ;;  %v210_v27 = vmax.f32 %v200_v22, 0.0 }
 0x131   :  { %v211_v28 = vmax.f32 %v203_v25, 0.0 }
 0x133   :  { %v212_v29 = vpack.c.bf16 %v211_v28, %v210_v27 }
 0x135   :  { %462 = vmatmul.mubr.bf16.vlgmr.msra.gmra.mrb[0].mxu1 %v212_v29 }
 0x208   :  { %v297_v31 = vpop.f32.mrb[0].mxu1 }
 0x209   :  { %v322_v32 = vadd.f32 %v404_v30, %v297_v31  ;;  %v463_v33 = vpop.f32.mrb[1].mxu1 }
 0x20a   :  { %v300_v34 = vpop.f32.mrb[2].mxu1 }
 0x20b   :  { %v323_v35 = vadd.f32 %v404_v30, %v300_v34  ;;  %v464_v36 = vpop.f32.mrb[3].mxu1  ;;  %v326_v37 = vadd.f32 %v322_v32, %v200_v22 }
 0x20d   :  { %328 = vadd.xlane.f32.xlu0 %v326_v37  ;;  %v327_v38 = vadd.f32 %v323_v35, %v203_v25 }
 0x211   :  { %330 = vadd.xlane.f32.xlu0 %v327_v38 }
 0x29a   :  { %v329_v39 = vpop.xlane.xlu0 %328 }
 0x29b   :  { %v333_v40 = vmul.f32 0.0078125, %v329_v39 }
 0x29d   :  { %v335_v41 = vsub.f32 %v326_v37, %v333_v40 }
 0x29e   :  { %v331_v42 = vpop.xlane.xlu0 %330 }
 0x29f   :  { %v334_v43 = vmul.f32 0.0078125, %v331_v42  ;;  %v337_v44 = vmul.f32 %v335_v41, %v335_v41 }
 0x2a1   :  { %v336_v45 = vsub.f32 %v327_v38, %v334_v43  ;;  %339 = vadd.xlane.f32.xlu1 %v337_v44 }
 0x2a3   :  { %v338_v46 = vmul.f32 %v336_v45, %v336_v45 }
 0x2a5   :  { %341 = vadd.xlane.f32.xlu1 %v338_v46 }
 0x32e   :  { %v340_v47 = vpop.xlane.xlu1 %339 }
 0x32f   :  { %v343_v48 = vmul.f32 0.0078125, %v340_v47 }
 0x331   :  { %v345_v49 = vadd.f32 1e-05, %v343_v48 }
 0x332   :  { %v342_v50 = vpop.xlane.xlu1 %341 }
 0x333   :  { %491 = vrsqrt.f32 %v345_v49  ;;  %v344_v51 = vmul.f32 0.0078125, %v342_v50 }
 0x335   :  { %v346_v52 = vadd.f32 1e-05, %v344_v51 }
 0x337   :  { %493 = vrsqrt.f32 %v346_v52 }
 0x33d   :  { %v492_v53 = vpop.eup %491 }
 0x33e   :  { %v349_v55 = vmul.f32 %v492_v53, %v335_v41 }
 0x340   :  { %v357_v57 = vmul.f32 %v405_v54, %v349_v55 }
 0x341   :  { %v494_v58 = vpop.eup %493 }
 0x342   :  { %v350_v59 = vmul.f32 %v494_v58, %v336_v45  ;;  %v365_v60 = vadd.f32 %v406_v56, %v357_v57 }
 0x344   :  { %v358_v61 = vmul.f32 %v405_v54, %v350_v59  ;;  %367 = vst [vmem:[#allocation10] sm:$0xff] %v365_v60 }
 0x346   :  { %v366_v62 = vadd.f32 %v406_v56, %v358_v61 }
 0x348   :  { %368 = vst [vmem:[#allocation10 + $0x8] sm:$0xff] %v366_v62 }
 0x349   :  { %572 = shalt.err (!%p569_p0)
}
 0x34a   :  { %s573_s24 = scalar_lea.hbm %s718_s7, 256 }
 0x34b   :  { %p574_p1 = scmp.ne.s32.totalorder %s718_s7, %s573_s24  ;;  %p577_p2 = scmp.lt.u32.totalorder %s573_s24, %s718_s7 }
 0x34d   :  { %p579_p3 = pnand %p577_p2, %p574_p1 }
 0x34f   :  { %582 = shalt.err (!%p579_p3)
}
 0x350   :  { %380 = dma.vmem_to_hbm [thread:$0]  %s375_s22, 256, %s718_s7, [#allocation6], %s593_s1, %s593_s1, %s594_s25  }
 0x351   :  { %587 = dma.done.wait [#allocation6], 256  }
 0x352   :  { %588 = vsyncadd [#allocation6], 4294967040 }
 0x353   :  { %384 = vsyncpa [#allocation5], 1 }
 0x354   :  { %385 = vsyncpa [#allocation8], 1 }
 0x355   :  { %386 = vsyncpa [#allocation6], 1 }

</bundles_post_ra>
